<compile_context>
chip_gen: v5e
topology: v5e:2x2
jax: 0.10.0
libtpu: 0.0.40
codegen_flags: <defaults>
</compile_context>

<pallas_src>
import functools

import jax
import jax.numpy as jnp
from jax.experimental import pallas as pl
from jax.experimental.pallas import tpu as pltpu


def _lstm_kernel(x_ref, wih1_ref, whh1_ref, b1_ref,
                 w2_ref, b2_ref, wfc_ref, bfc_ref,
                 out_ref,
                 h1, c1, h2, c2,
                 *, hidden_size, t_blk, n_batch):
    H = hidden_size
    N = n_batch
    tb = pl.program_id(0)

    @pl.when(tb == 0)
    def _():
        h1[...] = jnp.zeros_like(h1)
        c1[...] = jnp.zeros_like(c1)
        h2[...] = jnp.zeros_like(h2)
        c2[...] = jnp.zeros_like(c2)

    cdt = wih1_ref.dtype  # matmul-operand dtype (f32 or bf16)

    # ---- Hoisted layer-1 input projection for the whole time block:
    # x block is already laid out as (T_BLK * N, C) rows.
    x_blk = x_ref[...]
    pre1 = jnp.dot(x_blk, wih1_ref[...],
                   preferred_element_type=jnp.float32) + b1_ref[...]  # f32

    def gates_to_hc(gates, c_prev):
        # PyTorch gate order: i, f, g, o.  Gate math stays f32 (v5e-safe).
        i = jax.nn.sigmoid(gates[:, 0:H])
        f = jax.nn.sigmoid(gates[:, H:2 * H])
        g = jnp.tanh(gates[:, 2 * H:3 * H])
        o = jax.nn.sigmoid(gates[:, 3 * H:4 * H])
        c_new = f * c_prev + i * g
        h_new = o * jnp.tanh(c_new)
        return h_new, c_new

    # Load recurrent state once per block; carry in registers across the
    # statically unrolled steps; write back once at the end.
    h1_v = h1[...]
    c1_v = c1[...]
    h2_v = h2[...]
    c2_v = c2[...]

    whh1 = whh1_ref[...]   # (H, 4H)
    w2 = w2_ref[...]       # (2H, 4H) = [W_ih2; W_hh2] stacked
    b2 = b2_ref[...]

    for s in range(t_blk):
        # Layer 1: precomputed input gates + recurrent matmul only.
        g1 = pre1[s * N:(s + 1) * N, :] + jnp.dot(
            h1_v.astype(cdt), whh1, preferred_element_type=jnp.float32)
        h1_v, c1_v = gates_to_hc(g1, c1_v)

        # Layer 2: fused input+hidden gate matmul.
        inp2 = jnp.concatenate([h1_v, h2_v], axis=-1).astype(cdt)
        g2 = jnp.dot(inp2, w2, preferred_element_type=jnp.float32) + b2
        h2_v, c2_v = gates_to_hc(g2, c2_v)

    h1[...] = h1_v
    c1[...] = c1_v
    h2[...] = h2_v
    c2[...] = c2_v

    @pl.when(tb == pl.num_programs(0) - 1)
    def _():
        # fc(out[-1, :, :])
        out_ref[...] = (jnp.dot(h2_v.astype(cdt), wfc_ref[...],
                                preferred_element_type=jnp.float32)
                        + bfc_ref[...])


def lstmnet_forward(x, params, *, t_blk=8, compute_dtype=jnp.float32):
    """x: (N, C, T) float32, matching PyTorch forward(x) with x (batch, input_size, seq)."""
    N, C, T = x.shape
    H = params["whh1"].shape[0]          # weights stored transposed: (H, 4H)
    O = params["wfc"].shape[1]

    # Pad batch to a multiple of 8 sublanes (padded rows start from zero
    # state, are computed alongside, and sliced away at the end).
    N_pad = -(-N // 8) * 8
    x_p = jnp.pad(x, ((0, N_pad - N), (0, 0), (0, 0))) if N_pad != N else x

    # Pick a time-block size that divides T.
    t_blk = max(1, min(t_blk, T))
    while T % t_blk:
        t_blk -= 1

    # (N, C, T) -> (T, N, C) -> (T*N, C).
    # TODO(synk): at large T this transpose is a full HBM pass; fold it into a
    # precomputed whole-sequence input projection (einsum 'nct,cg->tng').
    xt = jnp.transpose(x_p, (2, 0, 1)).reshape(T * N_pad, C).astype(compute_dtype)

    wih1 = params["wih1"].astype(compute_dtype)
    whh1 = params["whh1"].astype(compute_dtype)
    w2 = jnp.concatenate([params["wih2"], params["whh2"]],
                         axis=0).astype(compute_dtype)       # (2H, 4H)
    wfc = params["wfc"].astype(compute_dtype)
    b1, b2, bfc = params["b1"], params["b2"], params["bfc"]  # biases stay f32

    kernel = functools.partial(_lstm_kernel, hidden_size=H,
                               t_blk=t_blk, n_batch=N_pad)

    # Constant-index weight/bias blocks: single-buffered (no revisit -> the
    # default double buffer is pure VMEM waste).
    const = dict(pipeline_mode=pl.Buffered(1))

    out = pl.pallas_call(
        kernel,
        out_shape=jax.ShapeDtypeStruct((N_pad, O), jnp.float32),
        grid_spec=pltpu.PrefetchScalarGridSpec(
            num_scalar_prefetch=0,
            grid=(T // t_blk,),
            in_specs=[
                pl.BlockSpec((t_blk * N_pad, C), lambda t: (t, 0)),          # x block
                pl.BlockSpec((C, 4 * H), lambda t: (0, 0), **const),          # W_ih^T layer 0
                pl.BlockSpec((H, 4 * H), lambda t: (0, 0), **const),          # W_hh^T layer 0
                pl.BlockSpec((1, 4 * H), lambda t: (0, 0), **const),          # b layer 0
                pl.BlockSpec((2 * H, 4 * H), lambda t: (0, 0), **const),      # [W_ih;W_hh]^T layer 1
                pl.BlockSpec((1, 4 * H), lambda t: (0, 0), **const),          # b layer 1
                pl.BlockSpec((H, O), lambda t: (0, 0), **const),              # fc weight^T
                pl.BlockSpec((1, O), lambda t: (0, 0), **const),              # fc bias
            ],
            out_specs=pl.BlockSpec((N_pad, O), lambda t: (0, 0)),
            scratch_shapes=[pltpu.VMEM((N_pad, H), jnp.float32)] * 4,  # h1,c1,h2,c2
        ),
        compiler_params=pltpu.CompilerParams(
            dimension_semantics=("arbitrary",),          # time is serial
            vmem_limit_bytes=64 * 1024 * 1024,
        ),
    )(xt, wih1, whh1, b1, w2, b2, wfc, bfc)
    return out[:N]


def init_params(key, input_size, hidden_size, output_dim):
    """Deterministic init mirroring PyTorch shapes; weights stored transposed."""
    H = hidden_size
    ks = jax.random.split(key, 10)
    k_lstm = 1.0 / jnp.sqrt(H)
    k_fc = 1.0 / jnp.sqrt(H)

    def u(k, shape, scale):
        return jax.random.uniform(k, shape, jnp.float32, -scale, scale)

    return {
        # layer 0
        "wih1": u(ks[0], (input_size, 4 * H), k_lstm),
        "whh1": u(ks[1], (H, 4 * H), k_lstm),
        "b1": u(ks[2], (1, 4 * H), k_lstm) + u(ks[3], (1, 4 * H), k_lstm),
        # layer 1
        "wih2": u(ks[4], (H, 4 * H), k_lstm),
        "whh2": u(ks[5], (H, 4 * H), k_lstm),
        "b2": u(ks[6], (1, 4 * H), k_lstm) + u(ks[7], (1, 4 * H), k_lstm),
        # fc head
        "wfc": u(ks[8], (H, output_dim), k_fc),
        "bfc": u(ks[9], (1, output_dim), k_fc),
    }


def lstmnet_ref(x, params):
    """Pure-JAX reference (lax.scan) for correctness checking."""
    xt = jnp.transpose(x, (2, 0, 1))
    N = x.shape[0]
    H = params["whh1"].shape[0]

    def cell(inp, h, c, wih, whh, b):
        g = inp @ wih + h @ whh + b
        i = jax.nn.sigmoid(g[:, :H])
        f = jax.nn.sigmoid(g[:, H:2 * H])
        gg = jnp.tanh(g[:, 2 * H:3 * H])
        o = jax.nn.sigmoid(g[:, 3 * H:])
        c = f * c + i * gg
        h = o * jnp.tanh(c)
        return h, c

    def step(carry, x_t):
        h1, c1, h2, c2 = carry
        h1, c1 = cell(x_t, h1, c1, params["wih1"], params["whh1"], params["b1"])
        h2, c2 = cell(h1, h2, c2, params["wih2"], params["whh2"], params["b2"])
        return (h1, c1, h2, c2), None

    init = tuple(jnp.zeros((N, H), jnp.float32) for _ in range(4))
    (_, _, h2, _), _ = jax.lax.scan(step, init, xt)
    return h2 @ params["wfc"] + params["bfc"]


if __name__ == "__main__":
    batch, input_size, seq_len = 2, 8, 8
    hidden_size, output_dim = 32, 4

    key = jax.random.PRNGKey(0)
    k_x, k_p = jax.random.split(key)
    x = jax.random.normal(k_x, (batch, input_size, seq_len), jnp.float32)
    params = init_params(k_p, input_size, hidden_size, output_dim)

    ref = lstmnet_ref(x, params)

    # f32 path, multi-block grid (exercises state carry across grid steps).
    out_f32 = jax.block_until_ready(
        lstmnet_forward(x, params, t_blk=4, compute_dtype=jnp.float32))
    assert out_f32.shape == (batch, output_dim)
    assert jnp.allclose(out_f32, ref, atol=1e-5, rtol=1e-5), (out_f32, ref)

    # bf16 matmul-operand path (f32 accumulate / f32 gates), single block.
    out_bf16 = jax.block_until_ready(
        lstmnet_forward(x, params, t_blk=8, compute_dtype=jnp.bfloat16))
    assert out_bf16.shape == (batch, output_dim)
    assert jnp.allclose(out_bf16, ref, atol=5e-2, rtol=5e-2), (out_bf16, ref)

    print("KERNEL_OK")
</pallas_src>

<mosaic_0001>
module attributes {stable_mosaic.version = 11 : i64} {
  func.func @_lstm_kernel(%arg0: i32, %arg1: memref<32x8xf32, #tpu.memory_space<vmem>>, %arg2: memref<8x128xf32, #tpu.memory_space<vmem>>, %arg3: memref<32x128xf32, #tpu.memory_space<vmem>>, %arg4: memref<1x128xf32, #tpu.memory_space<vmem>>, %arg5: memref<64x128xf32, #tpu.memory_space<vmem>>, %arg6: memref<1x128xf32, #tpu.memory_space<vmem>>, %arg7: memref<32x4xf32, #tpu.memory_space<vmem>>, %arg8: memref<1x4xf32, #tpu.memory_space<vmem>>, %arg9: memref<8x4xf32, #tpu.memory_space<vmem>>, %arg10: memref<8x32xf32, #tpu.memory_space<vmem>>, %arg11: memref<8x32xf32, #tpu.memory_space<vmem>>, %arg12: memref<8x32xf32, #tpu.memory_space<vmem>>, %arg13: memref<8x32xf32, #tpu.memory_space<vmem>>) attributes {dimension_semantics = [#tpu.dimension_semantics<arbitrary>], iteration_bounds = array<i64: 2>, scalar_prefetch = 0 : i64, scratch_operands = 4 : i64, tpu.core_type = #tpu.core_type<tc>, window_params = [{transform_indices = @transform_0, window_bounds = array<i64: 32, 8>}, {pipeline_mode = #tpu.pipeline_mode<synchronous>, transform_indices = @transform_1, window_bounds = array<i64: 8, 128>}, {pipeline_mode = #tpu.pipeline_mode<synchronous>, transform_indices = @transform_2, window_bounds = array<i64: 32, 128>}, {pipeline_mode = #tpu.pipeline_mode<synchronous>, transform_indices = @transform_3, window_bounds = array<i64: 1, 128>}, {pipeline_mode = #tpu.pipeline_mode<synchronous>, transform_indices = @transform_4, window_bounds = array<i64: 64, 128>}, {pipeline_mode = #tpu.pipeline_mode<synchronous>, transform_indices = @transform_5, window_bounds = array<i64: 1, 128>}, {pipeline_mode = #tpu.pipeline_mode<synchronous>, transform_indices = @transform_6, window_bounds = array<i64: 32, 4>}, {pipeline_mode = #tpu.pipeline_mode<synchronous>, transform_indices = @transform_7, window_bounds = array<i64: 1, 4>}, {pipeline_mode = #tpu.pipeline_mode<synchronous>, transform_indices = @transform_8, window_bounds = array<i64: 8, 4>}]} {
    %c0_i32 = arith.constant 0 : i32
    %0 = arith.cmpi eq, %arg0, %c0_i32 : i32
    %1 = arith.extui %0 : i1 to i32
    %c0_i32_0 = arith.constant 0 : i32
    %2 = arith.cmpi ne, %1, %c0_i32_0 : i32
    scf.if %2 {
      %cst_61 = arith.constant 0.000000e+00 : f32
      %251 = vector.broadcast %cst_61 : f32 to vector<8x32xf32>
      %c0_62 = arith.constant 0 : index
      %c0_63 = arith.constant 0 : index
      %252 = vector.load %arg10[%c0_62, %c0_63] : memref<8x32xf32, #tpu.memory_space<vmem>>, vector<8x32xf32>
      tpu.vector_store %arg10[%c0_62, %c0_63], %251 {strides = array<i32>} : memref<8x32xf32, #tpu.memory_space<vmem>>, vector<8x32xf32>,
      %cst_64 = arith.constant 0.000000e+00 : f32
      %253 = vector.broadcast %cst_64 : f32 to vector<8x32xf32>
      %c0_65 = arith.constant 0 : index
      %c0_66 = arith.constant 0 : index
      %254 = vector.load %arg11[%c0_65, %c0_66] : memref<8x32xf32, #tpu.memory_space<vmem>>, vector<8x32xf32>
      tpu.vector_store %arg11[%c0_65, %c0_66], %253 {strides = array<i32>} : memref<8x32xf32, #tpu.memory_space<vmem>>, vector<8x32xf32>,
      %cst_67 = arith.constant 0.000000e+00 : f32
      %255 = vector.broadcast %cst_67 : f32 to vector<8x32xf32>
      %c0_68 = arith.constant 0 : index
      %c0_69 = arith.constant 0 : index
      %256 = vector.load %arg12[%c0_68, %c0_69] : memref<8x32xf32, #tpu.memory_space<vmem>>, vector<8x32xf32>
      tpu.vector_store %arg12[%c0_68, %c0_69], %255 {strides = array<i32>} : memref<8x32xf32, #tpu.memory_space<vmem>>, vector<8x32xf32>,
      %cst_70 = arith.constant 0.000000e+00 : f32
      %257 = vector.broadcast %cst_70 : f32 to vector<8x32xf32>
      %c0_71 = arith.constant 0 : index
      %c0_72 = arith.constant 0 : index
      %258 = vector.load %arg13[%c0_71, %c0_72] : memref<8x32xf32, #tpu.memory_space<vmem>>, vector<8x32xf32>
      tpu.vector_store %arg13[%c0_71, %c0_72], %257 {strides = array<i32>} : memref<8x32xf32, #tpu.memory_space<vmem>>, vector<8x32xf32>,
    } else {
    }
    %c0 = arith.constant 0 : index
    %c0_1 = arith.constant 0 : index
    %3 = vector.load %arg1[%c0, %c0_1] : memref<32x8xf32, #tpu.memory_space<vmem>>, vector<32x8xf32>
    %c0_2 = arith.constant 0 : index
    %c0_3 = arith.constant 0 : index
    %4 = vector.load %arg2[%c0_2, %c0_3] : memref<8x128xf32, #tpu.memory_space<vmem>>, vector<8x128xf32>
    %cst = arith.constant dense<0.000000e+00> : vector<32x128xf32>
    %5 = tpu.matmul %3, %4, %cst {dimension_numbers = #tpu.dot_dimension_numbers<[1], [0], [0], [1], [0, 0, 1, 1], [], []>} : vector<32x8xf32>, vector<8x128xf32>, vector<32x128xf32> -> vector<32x128xf32>
    %c0_4 = arith.constant 0 : index
    %c0_5 = arith.constant 0 : index
    %6 = vector.load %arg4[%c0_4, %c0_5] : memref<1x128xf32, #tpu.memory_space<vmem>>, vector<1x128xf32>
    %7 = vector.broadcast %6 : vector<1x128xf32> to vector<32x128xf32>
    %8 = arith.addf %5, %7 : vector<32x128xf32>
    %c0_6 = arith.constant 0 : index
    %c0_7 = arith.constant 0 : index
    %9 = vector.load %arg10[%c0_6, %c0_7] : memref<8x32xf32, #tpu.memory_space<vmem>>, vector<8x32xf32>
    %c0_8 = arith.constant 0 : index
    %c0_9 = arith.constant 0 : index
    %10 = vector.load %arg11[%c0_8, %c0_9] : memref<8x32xf32, #tpu.memory_space<vmem>>, vector<8x32xf32>
    %c0_10 = arith.constant 0 : index
    %c0_11 = arith.constant 0 : index
    %11 = vector.load %arg12[%c0_10, %c0_11] : memref<8x32xf32, #tpu.memory_space<vmem>>, vector<8x32xf32>
    %c0_12 = arith.constant 0 : index
    %c0_13 = arith.constant 0 : index
    %12 = vector.load %arg13[%c0_12, %c0_13] : memref<8x32xf32, #tpu.memory_space<vmem>>, vector<8x32xf32>
    %c0_14 = arith.constant 0 : index
    %c0_15 = arith.constant 0 : index
    %13 = vector.load %arg3[%c0_14, %c0_15] : memref<32x128xf32, #tpu.memory_space<vmem>>, vector<32x128xf32>
    %c0_16 = arith.constant 0 : index
    %c0_17 = arith.constant 0 : index
    %14 = vector.load %arg5[%c0_16, %c0_17] : memref<64x128xf32, #tpu.memory_space<vmem>>, vector<64x128xf32>
    %c0_18 = arith.constant 0 : index
    %c0_19 = arith.constant 0 : index
    %15 = vector.load %arg6[%c0_18, %c0_19] : memref<1x128xf32, #tpu.memory_space<vmem>>, vector<1x128xf32>
    %16 = vector.extract_strided_slice %8 {offsets = [0, 0], sizes = [8, 128], strides = [1, 1]} : vector<32x128xf32> to vector<8x128xf32>
    %cst_20 = arith.constant dense<0.000000e+00> : vector<8x128xf32>
    %17 = tpu.matmul %9, %13, %cst_20 {dimension_numbers = #tpu.dot_dimension_numbers<[1], [0], [0], [1], [0, 0, 1, 1], [], []>} : vector<8x32xf32>, vector<32x128xf32>, vector<8x128xf32> -> vector<8x128xf32>
    %18 = arith.addf %16, %17 : vector<8x128xf32>
    %19 = vector.extract_strided_slice %18 {offsets = [0, 0], sizes = [8, 32], strides = [1, 1]} : vector<8x128xf32> to vector<8x32xf32>
    %20 = arith.negf %19 : vector<8x32xf32>
    %21 = math.exp %20 : vector<8x32xf32>
    %cst_21 = arith.constant 1.000000e+00 : f32
    %22 = vector.broadcast %cst_21 : f32 to vector<8x32xf32>
    %23 = arith.addf %22, %21 : vector<8x32xf32>
    %24 = arith.divf %22, %23 : vector<8x32xf32>
    %25 = vector.extract_strided_slice %18 {offsets = [0, 32], sizes = [8, 32], strides = [1, 1]} : vector<8x128xf32> to vector<8x32xf32>
    %26 = arith.negf %25 : vector<8x32xf32>
    %27 = math.exp %26 : vector<8x32xf32>
    %cst_22 = arith.constant 1.000000e+00 : f32
    %28 = vector.broadcast %cst_22 : f32 to vector<8x32xf32>
    %29 = arith.addf %28, %27 : vector<8x32xf32>
    %30 = arith.divf %28, %29 : vector<8x32xf32>
    %31 = vector.extract_strided_slice %18 {offsets = [0, 64], sizes = [8, 32], strides = [1, 1]} : vector<8x128xf32> to vector<8x32xf32>
    %32 = math.tanh %31 : vector<8x32xf32>
    %33 = vector.extract_strided_slice %18 {offsets = [0, 96], sizes = [8, 32], strides = [1, 1]} : vector<8x128xf32> to vector<8x32xf32>
    %34 = arith.negf %33 : vector<8x32xf32>
    %35 = math.exp %34 : vector<8x32xf32>
    %cst_23 = arith.constant 1.000000e+00 : f32
    %36 = vector.broadcast %cst_23 : f32 to vector<8x32xf32>
    %37 = arith.addf %36, %35 : vector<8x32xf32>
    %38 = arith.divf %36, %37 : vector<8x32xf32>
    %39 = arith.mulf %30, %10 : vector<8x32xf32>
    %40 = arith.mulf %24, %32 : vector<8x32xf32>
    %41 = arith.addf %39, %40 : vector<8x32xf32>
    %42 = math.tanh %41 : vector<8x32xf32>
    %43 = arith.mulf %38, %42 : vector<8x32xf32>
    %44 = tpu.concatenate %43, %11 in 1 : vector<8x32xf32>, vector<8x32xf32> -> vector<8x64xf32>
    %cst_24 = arith.constant dense<0.000000e+00> : vector<8x128xf32>
    %45 = tpu.matmul %44, %14, %cst_24 {dimension_numbers = #tpu.dot_dimension_numbers<[1], [0], [0], [1], [0, 0, 1, 1], [], []>} : vector<8x64xf32>, vector<64x128xf32>, vector<8x128xf32> -> vector<8x128xf32>
    %46 = vector.broadcast %15 : vector<1x128xf32> to vector<8x128xf32>
    %47 = arith.addf %45, %46 : vector<8x128xf32>
    %48 = vector.extract_strided_slice %47 {offsets = [0, 0], sizes = [8, 32], strides = [1, 1]} : vector<8x128xf32> to vector<8x32xf32>
    %49 = arith.negf %48 : vector<8x32xf32>
    %50 = math.exp %49 : vector<8x32xf32>
    %cst_25 = arith.constant 1.000000e+00 : f32
    %51 = vector.broadcast %cst_25 : f32 to vector<8x32xf32>
    %52 = arith.addf %51, %50 : vector<8x32xf32>
    %53 = arith.divf %51, %52 : vector<8x32xf32>
    %54 = vector.extract_strided_slice %47 {offsets = [0, 32], sizes = [8, 32], strides = [1, 1]} : vector<8x128xf32> to vector<8x32xf32>
    %55 = arith.negf %54 : vector<8x32xf32>
    %56 = math.exp %55 : vector<8x32xf32>
    %cst_26 = arith.constant 1.000000e+00 : f32
    %57 = vector.broadcast %cst_26 : f32 to vector<8x32xf32>
    %58 = arith.addf %57, %56 : vector<8x32xf32>
    %59 = arith.divf %57, %58 : vector<8x32xf32>
    %60 = vector.extract_strided_slice %47 {offsets = [0, 64], sizes = [8, 32], strides = [1, 1]} : vector<8x128xf32> to vector<8x32xf32>
    %61 = math.tanh %60 : vector<8x32xf32>
    %62 = vector.extract_strided_slice %47 {offsets = [0, 96], sizes = [8, 32], strides = [1, 1]} : vector<8x128xf32> to vector<8x32xf32>
    %63 = arith.negf %62 : vector<8x32xf32>
    %64 = math.exp %63 : vector<8x32xf32>
    %cst_27 = arith.constant 1.000000e+00 : f32
    %65 = vector.broadcast %cst_27 : f32 to vector<8x32xf32>
    %66 = arith.addf %65, %64 : vector<8x32xf32>
    %67 = arith.divf %65, %66 : vector<8x32xf32>
    %68 = arith.mulf %59, %12 : vector<8x32xf32>
    %69 = arith.mulf %53, %61 : vector<8x32xf32>
    %70 = arith.addf %68, %69 : vector<8x32xf32>
    %71 = math.tanh %70 : vector<8x32xf32>
    %72 = arith.mulf %67, %71 : vector<8x32xf32>
    %73 = vector.extract_strided_slice %8 {offsets = [8, 0], sizes = [8, 128], strides = [1, 1]} : vector<32x128xf32> to vector<8x128xf32>
    %cst_28 = arith.constant dense<0.000000e+00> : vector<8x128xf32>
    %74 = tpu.matmul %43, %13, %cst_28 {dimension_numbers = #tpu.dot_dimension_numbers<[1], [0], [0], [1], [0, 0, 1, 1], [], []>} : vector<8x32xf32>, vector<32x128xf32>, vector<8x128xf32> -> vector<8x128xf32>
    %75 = arith.addf %73, %74 : vector<8x128xf32>
    %76 = vector.extract_strided_slice %75 {offsets = [0, 0], sizes = [8, 32], strides = [1, 1]} : vector<8x128xf32> to vector<8x32xf32>
    %77 = arith.negf %76 : vector<8x32xf32>
    %78 = math.exp %77 : vector<8x32xf32>
    %cst_29 = arith.constant 1.000000e+00 : f32
    %79 = vector.broadcast %cst_29 : f32 to vector<8x32xf32>
    %80 = arith.addf %79, %78 : vector<8x32xf32>
    %81 = arith.divf %79, %80 : vector<8x32xf32>
    %82 = vector.extract_strided_slice %75 {offsets = [0, 32], sizes = [8, 32], strides = [1, 1]} : vector<8x128xf32> to vector<8x32xf32>
    %83 = arith.negf %82 : vector<8x32xf32>
    %84 = math.exp %83 : vector<8x32xf32>
    %cst_30 = arith.constant 1.000000e+00 : f32
    %85 = vector.broadcast %cst_30 : f32 to vector<8x32xf32>
    %86 = arith.addf %85, %84 : vector<8x32xf32>
    %87 = arith.divf %85, %86 : vector<8x32xf32>
    %88 = vector.extract_strided_slice %75 {offsets = [0, 64], sizes = [8, 32], strides = [1, 1]} : vector<8x128xf32> to vector<8x32xf32>
    %89 = math.tanh %88 : vector<8x32xf32>
    %90 = vector.extract_strided_slice %75 {offsets = [0, 96], sizes = [8, 32], strides = [1, 1]} : vector<8x128xf32> to vector<8x32xf32>
    %91 = arith.negf %90 : vector<8x32xf32>
    %92 = math.exp %91 : vector<8x32xf32>
    %cst_31 = arith.constant 1.000000e+00 : f32
    %93 = vector.broadcast %cst_31 : f32 to vector<8x32xf32>
    %94 = arith.addf %93, %92 : vector<8x32xf32>
    %95 = arith.divf %93, %94 : vector<8x32xf32>
    %96 = arith.mulf %87, %41 : vector<8x32xf32>
    %97 = arith.mulf %81, %89 : vector<8x32xf32>
    %98 = arith.addf %96, %97 : vector<8x32xf32>
    %99 = math.tanh %98 : vector<8x32xf32>
    %100 = arith.mulf %95, %99 : vector<8x32xf32>
    %101 = tpu.concatenate %100, %72 in 1 : vector<8x32xf32>, vector<8x32xf32> -> vector<8x64xf32>
    %cst_32 = arith.constant dense<0.000000e+00> : vector<8x128xf32>
    %102 = tpu.matmul %101, %14, %cst_32 {dimension_numbers = #tpu.dot_dimension_numbers<[1], [0], [0], [1], [0, 0, 1, 1], [], []>} : vector<8x64xf32>, vector<64x128xf32>, vector<8x128xf32> -> vector<8x128xf32>
    %103 = vector.broadcast %15 : vector<1x128xf32> to vector<8x128xf32>
    %104 = arith.addf %102, %103 : vector<8x128xf32>
    %105 = vector.extract_strided_slice %104 {offsets = [0, 0], sizes = [8, 32], strides = [1, 1]} : vector<8x128xf32> to vector<8x32xf32>
    %106 = arith.negf %105 : vector<8x32xf32>
    %107 = math.exp %106 : vector<8x32xf32>
    %cst_33 = arith.constant 1.000000e+00 : f32
    %108 = vector.broadcast %cst_33 : f32 to vector<8x32xf32>
    %109 = arith.addf %108, %107 : vector<8x32xf32>
    %110 = arith.divf %108, %109 : vector<8x32xf32>
    %111 = vector.extract_strided_slice %104 {offsets = [0, 32], sizes = [8, 32], strides = [1, 1]} : vector<8x128xf32> to vector<8x32xf32>
    %112 = arith.negf %111 : vector<8x32xf32>
    %113 = math.exp %112 : vector<8x32xf32>
    %cst_34 = arith.constant 1.000000e+00 : f32
    %114 = vector.broadcast %cst_34 : f32 to vector<8x32xf32>
    %115 = arith.addf %114, %113 : vector<8x32xf32>
    %116 = arith.divf %114, %115 : vector<8x32xf32>
    %117 = vector.extract_strided_slice %104 {offsets = [0, 64], sizes = [8, 32], strides = [1, 1]} : vector<8x128xf32> to vector<8x32xf32>
    %118 = math.tanh %117 : vector<8x32xf32>
    %119 = vector.extract_strided_slice %104 {offsets = [0, 96], sizes = [8, 32], strides = [1, 1]} : vector<8x128xf32> to vector<8x32xf32>
    %120 = arith.negf %119 : vector<8x32xf32>
    %121 = math.exp %120 : vector<8x32xf32>
    %cst_35 = arith.constant 1.000000e+00 : f32
    %122 = vector.broadcast %cst_35 : f32 to vector<8x32xf32>
    %123 = arith.addf %122, %121 : vector<8x32xf32>
    %124 = arith.divf %122, %123 : vector<8x32xf32>
    %125 = arith.mulf %116, %70 : vector<8x32xf32>
    %126 = arith.mulf %110, %118 : vector<8x32xf32>
    %127 = arith.addf %125, %126 : vector<8x32xf32>
    %128 = math.tanh %127 : vector<8x32xf32>
    %129 = arith.mulf %124, %128 : vector<8x32xf32>
    %130 = vector.extract_strided_slice %8 {offsets = [16, 0], sizes = [8, 128], strides = [1, 1]} : vector<32x128xf32> to vector<8x128xf32>
    %cst_36 = arith.constant dense<0.000000e+00> : vector<8x128xf32>
    %131 = tpu.matmul %100, %13, %cst_36 {dimension_numbers = #tpu.dot_dimension_numbers<[1], [0], [0], [1], [0, 0, 1, 1], [], []>} : vector<8x32xf32>, vector<32x128xf32>, vector<8x128xf32> -> vector<8x128xf32>
    %132 = arith.addf %130, %131 : vector<8x128xf32>
    %133 = vector.extract_strided_slice %132 {offsets = [0, 0], sizes = [8, 32], strides = [1, 1]} : vector<8x128xf32> to vector<8x32xf32>
    %134 = arith.negf %133 : vector<8x32xf32>
    %135 = math.exp %134 : vector<8x32xf32>
    %cst_37 = arith.constant 1.000000e+00 : f32
    %136 = vector.broadcast %cst_37 : f32 to vector<8x32xf32>
    %137 = arith.addf %136, %135 : vector<8x32xf32>
    %138 = arith.divf %136, %137 : vector<8x32xf32>
    %139 = vector.extract_strided_slice %132 {offsets = [0, 32], sizes = [8, 32], strides = [1, 1]} : vector<8x128xf32> to vector<8x32xf32>
    %140 = arith.negf %139 : vector<8x32xf32>
    %141 = math.exp %140 : vector<8x32xf32>
    %cst_38 = arith.constant 1.000000e+00 : f32
    %142 = vector.broadcast %cst_38 : f32 to vector<8x32xf32>
    %143 = arith.addf %142, %141 : vector<8x32xf32>
    %144 = arith.divf %142, %143 : vector<8x32xf32>
    %145 = vector.extract_strided_slice %132 {offsets = [0, 64], sizes = [8, 32], strides = [1, 1]} : vector<8x128xf32> to vector<8x32xf32>
    %146 = math.tanh %145 : vector<8x32xf32>
    %147 = vector.extract_strided_slice %132 {offsets = [0, 96], sizes = [8, 32], strides = [1, 1]} : vector<8x128xf32> to vector<8x32xf32>
    %148 = arith.negf %147 : vector<8x32xf32>
    %149 = math.exp %148 : vector<8x32xf32>
    %cst_39 = arith.constant 1.000000e+00 : f32
    %150 = vector.broadcast %cst_39 : f32 to vector<8x32xf32>
    %151 = arith.addf %150, %149 : vector<8x32xf32>
    %152 = arith.divf %150, %151 : vector<8x32xf32>
    %153 = arith.mulf %144, %98 : vector<8x32xf32>
    %154 = arith.mulf %138, %146 : vector<8x32xf32>
    %155 = arith.addf %153, %154 : vector<8x32xf32>
    %156 = math.tanh %155 : vector<8x32xf32>
    %157 = arith.mulf %152, %156 : vector<8x32xf32>
    %158 = tpu.concatenate %157, %129 in 1 : vector<8x32xf32>, vector<8x32xf32> -> vector<8x64xf32>
    %cst_40 = arith.constant dense<0.000000e+00> : vector<8x128xf32>
    %159 = tpu.matmul %158, %14, %cst_40 {dimension_numbers = #tpu.dot_dimension_numbers<[1], [0], [0], [1], [0, 0, 1, 1], [], []>} : vector<8x64xf32>, vector<64x128xf32>, vector<8x128xf32> -> vector<8x128xf32>
    %160 = vector.broadcast %15 : vector<1x128xf32> to vector<8x128xf32>
    %161 = arith.addf %159, %160 : vector<8x128xf32>
    %162 = vector.extract_strided_slice %161 {offsets = [0, 0], sizes = [8, 32], strides = [1, 1]} : vector<8x128xf32> to vector<8x32xf32>
    %163 = arith.negf %162 : vector<8x32xf32>
    %164 = math.exp %163 : vector<8x32xf32>
    %cst_41 = arith.constant 1.000000e+00 : f32
    %165 = vector.broadcast %cst_41 : f32 to vector<8x32xf32>
    %166 = arith.addf %165, %164 : vector<8x32xf32>
    %167 = arith.divf %165, %166 : vector<8x32xf32>
    %168 = vector.extract_strided_slice %161 {offsets = [0, 32], sizes = [8, 32], strides = [1, 1]} : vector<8x128xf32> to vector<8x32xf32>
    %169 = arith.negf %168 : vector<8x32xf32>
    %170 = math.exp %169 : vector<8x32xf32>
    %cst_42 = arith.constant 1.000000e+00 : f32
    %171 = vector.broadcast %cst_42 : f32 to vector<8x32xf32>
    %172 = arith.addf %171, %170 : vector<8x32xf32>
    %173 = arith.divf %171, %172 : vector<8x32xf32>
    %174 = vector.extract_strided_slice %161 {offsets = [0, 64], sizes = [8, 32], strides = [1, 1]} : vector<8x128xf32> to vector<8x32xf32>
    %175 = math.tanh %174 : vector<8x32xf32>
    %176 = vector.extract_strided_slice %161 {offsets = [0, 96], sizes = [8, 32], strides = [1, 1]} : vector<8x128xf32> to vector<8x32xf32>
    %177 = arith.negf %176 : vector<8x32xf32>
    %178 = math.exp %177 : vector<8x32xf32>
    %cst_43 = arith.constant 1.000000e+00 : f32
    %179 = vector.broadcast %cst_43 : f32 to vector<8x32xf32>
    %180 = arith.addf %179, %178 : vector<8x32xf32>
    %181 = arith.divf %179, %180 : vector<8x32xf32>
    %182 = arith.mulf %173, %127 : vector<8x32xf32>
    %183 = arith.mulf %167, %175 : vector<8x32xf32>
    %184 = arith.addf %182, %183 : vector<8x32xf32>
    %185 = math.tanh %184 : vector<8x32xf32>
    %186 = arith.mulf %181, %185 : vector<8x32xf32>
    %187 = vector.extract_strided_slice %8 {offsets = [24, 0], sizes = [8, 128], strides = [1, 1]} : vector<32x128xf32> to vector<8x128xf32>
    %cst_44 = arith.constant dense<0.000000e+00> : vector<8x128xf32>
    %188 = tpu.matmul %157, %13, %cst_44 {dimension_numbers = #tpu.dot_dimension_numbers<[1], [0], [0], [1], [0, 0, 1, 1], [], []>} : vector<8x32xf32>, vector<32x128xf32>, vector<8x128xf32> -> vector<8x128xf32>
    %189 = arith.addf %187, %188 : vector<8x128xf32>
    %190 = vector.extract_strided_slice %189 {offsets = [0, 0], sizes = [8, 32], strides = [1, 1]} : vector<8x128xf32> to vector<8x32xf32>
    %191 = arith.negf %190 : vector<8x32xf32>
    %192 = math.exp %191 : vector<8x32xf32>
    %cst_45 = arith.constant 1.000000e+00 : f32
    %193 = vector.broadcast %cst_45 : f32 to vector<8x32xf32>
    %194 = arith.addf %193, %192 : vector<8x32xf32>
    %195 = arith.divf %193, %194 : vector<8x32xf32>
    %196 = vector.extract_strided_slice %189 {offsets = [0, 32], sizes = [8, 32], strides = [1, 1]} : vector<8x128xf32> to vector<8x32xf32>
    %197 = arith.negf %196 : vector<8x32xf32>
    %198 = math.exp %197 : vector<8x32xf32>
    %cst_46 = arith.constant 1.000000e+00 : f32
    %199 = vector.broadcast %cst_46 : f32 to vector<8x32xf32>
    %200 = arith.addf %199, %198 : vector<8x32xf32>
    %201 = arith.divf %199, %200 : vector<8x32xf32>
    %202 = vector.extract_strided_slice %189 {offsets = [0, 64], sizes = [8, 32], strides = [1, 1]} : vector<8x128xf32> to vector<8x32xf32>
    %203 = math.tanh %202 : vector<8x32xf32>
    %204 = vector.extract_strided_slice %189 {offsets = [0, 96], sizes = [8, 32], strides = [1, 1]} : vector<8x128xf32> to vector<8x32xf32>
    %205 = arith.negf %204 : vector<8x32xf32>
    %206 = math.exp %205 : vector<8x32xf32>
    %cst_47 = arith.constant 1.000000e+00 : f32
    %207 = vector.broadcast %cst_47 : f32 to vector<8x32xf32>
    %208 = arith.addf %207, %206 : vector<8x32xf32>
    %209 = arith.divf %207, %208 : vector<8x32xf32>
    %210 = arith.mulf %201, %155 : vector<8x32xf32>
    %211 = arith.mulf %195, %203 : vector<8x32xf32>
    %212 = arith.addf %210, %211 : vector<8x32xf32>
    %213 = math.tanh %212 : vector<8x32xf32>
    %214 = arith.mulf %209, %213 : vector<8x32xf32>
    %215 = tpu.concatenate %214, %186 in 1 : vector<8x32xf32>, vector<8x32xf32> -> vector<8x64xf32>
    %cst_48 = arith.constant dense<0.000000e+00> : vector<8x128xf32>
    %216 = tpu.matmul %215, %14, %cst_48 {dimension_numbers = #tpu.dot_dimension_numbers<[1], [0], [0], [1], [0, 0, 1, 1], [], []>} : vector<8x64xf32>, vector<64x128xf32>, vector<8x128xf32> -> vector<8x128xf32>
    %217 = vector.broadcast %15 : vector<1x128xf32> to vector<8x128xf32>
    %218 = arith.addf %216, %217 : vector<8x128xf32>
    %219 = vector.extract_strided_slice %218 {offsets = [0, 0], sizes = [8, 32], strides = [1, 1]} : vector<8x128xf32> to vector<8x32xf32>
    %220 = arith.negf %219 : vector<8x32xf32>
    %221 = math.exp %220 : vector<8x32xf32>
    %cst_49 = arith.constant 1.000000e+00 : f32
    %222 = vector.broadcast %cst_49 : f32 to vector<8x32xf32>
    %223 = arith.addf %222, %221 : vector<8x32xf32>
    %224 = arith.divf %222, %223 : vector<8x32xf32>
    %225 = vector.extract_strided_slice %218 {offsets = [0, 32], sizes = [8, 32], strides = [1, 1]} : vector<8x128xf32> to vector<8x32xf32>
    %226 = arith.negf %225 : vector<8x32xf32>
    %227 = math.exp %226 : vector<8x32xf32>
    %cst_50 = arith.constant 1.000000e+00 : f32
    %228 = vector.broadcast %cst_50 : f32 to vector<8x32xf32>
    %229 = arith.addf %228, %227 : vector<8x32xf32>
    %230 = arith.divf %228, %229 : vector<8x32xf32>
    %231 = vector.extract_strided_slice %218 {offsets = [0, 64], sizes = [8, 32], strides = [1, 1]} : vector<8x128xf32> to vector<8x32xf32>
    %232 = math.tanh %231 : vector<8x32xf32>
    %233 = vector.extract_strided_slice %218 {offsets = [0, 96], sizes = [8, 32], strides = [1, 1]} : vector<8x128xf32> to vector<8x32xf32>
    %234 = arith.negf %233 : vector<8x32xf32>
    %235 = math.exp %234 : vector<8x32xf32>
    %cst_51 = arith.constant 1.000000e+00 : f32
    %236 = vector.broadcast %cst_51 : f32 to vector<8x32xf32>
    %237 = arith.addf %236, %235 : vector<8x32xf32>
    %238 = arith.divf %236, %237 : vector<8x32xf32>
    %239 = arith.mulf %230, %184 : vector<8x32xf32>
    %240 = arith.mulf %224, %232 : vector<8x32xf32>
    %241 = arith.addf %239, %240 : vector<8x32xf32>
    %242 = math.tanh %241 : vector<8x32xf32>
    %243 = arith.mulf %238, %242 : vector<8x32xf32>
    %c0_52 = arith.constant 0 : index
    %c0_53 = arith.constant 0 : index
    %244 = vector.load %arg10[%c0_52, %c0_53] : memref<8x32xf32, #tpu.memory_space<vmem>>, vector<8x32xf32>
    tpu.vector_store %arg10[%c0_52, %c0_53], %214 {strides = array<i32>} : memref<8x32xf32, #tpu.memory_space<vmem>>, vector<8x32xf32>,
    %c0_54 = arith.constant 0 : index
    %c0_55 = arith.constant 0 : index
    %245 = vector.load %arg11[%c0_54, %c0_55] : memref<8x32xf32, #tpu.memory_space<vmem>>, vector<8x32xf32>
    tpu.vector_store %arg11[%c0_54, %c0_55], %212 {strides = array<i32>} : memref<8x32xf32, #tpu.memory_space<vmem>>, vector<8x32xf32>,
    %c0_56 = arith.constant 0 : index
    %c0_57 = arith.constant 0 : index
    %246 = vector.load %arg12[%c0_56, %c0_57] : memref<8x32xf32, #tpu.memory_space<vmem>>, vector<8x32xf32>
    tpu.vector_store %arg12[%c0_56, %c0_57], %243 {strides = array<i32>} : memref<8x32xf32, #tpu.memory_space<vmem>>, vector<8x32xf32>,
    %c0_58 = arith.constant 0 : index
    %c0_59 = arith.constant 0 : index
    %247 = vector.load %arg13[%c0_58, %c0_59] : memref<8x32xf32, #tpu.memory_space<vmem>>, vector<8x32xf32>
    tpu.vector_store %arg13[%c0_58, %c0_59], %241 {strides = array<i32>} : memref<8x32xf32, #tpu.memory_space<vmem>>, vector<8x32xf32>,
    %c1_i32 = arith.constant 1 : i32
    %248 = arith.cmpi eq, %arg0, %c1_i32 : i32
    %249 = arith.extui %248 : i1 to i32
    %c0_i32_60 = arith.constant 0 : i32
    %250 = arith.cmpi ne, %249, %c0_i32_60 : i32
    scf.if %250 {
      %c0_61 = arith.constant 0 : index
      %c0_62 = arith.constant 0 : index
      %251 = vector.load %arg7[%c0_61, %c0_62] : memref<32x4xf32, #tpu.memory_space<vmem>>, vector<32x4xf32>
      %cst_63 = arith.constant dense<0.000000e+00> : vector<8x4xf32>
      %252 = tpu.matmul %243, %251, %cst_63 {dimension_numbers = #tpu.dot_dimension_numbers<[1], [0], [0], [1], [0, 0, 1, 1], [], []>} : vector<8x32xf32>, vector<32x4xf32>, vector<8x4xf32> -> vector<8x4xf32>
      %c0_64 = arith.constant 0 : index
      %c0_65 = arith.constant 0 : index
      %253 = vector.load %arg8[%c0_64, %c0_65] : memref<1x4xf32, #tpu.memory_space<vmem>>, vector<1x4xf32>
      %254 = vector.broadcast %253 : vector<1x4xf32> to vector<8x4xf32>
      %255 = arith.addf %252, %254 : vector<8x4xf32>
      %c0_66 = arith.constant 0 : index
      %c0_67 = arith.constant 0 : index
      %256 = vector.load %arg9[%c0_66, %c0_67] : memref<8x4xf32, #tpu.memory_space<vmem>>, vector<8x4xf32>
      tpu.vector_store %arg9[%c0_66, %c0_67], %255 {strides = array<i32>} : memref<8x4xf32, #tpu.memory_space<vmem>>, vector<8x4xf32>,
    } else {
    }
    return
  }
  func.func @transform_0(%arg0: i32) -> (i32, i32) {
    %c0_i32 = arith.constant 0 : i32
    %c0_i32_0 = arith.constant 0 : i32
    return %arg0, %c0_i32 : i32, i32
  }
  func.func @transform_1(%arg0: i32) -> (i32, i32) {
    %c0_i32 = arith.constant 0 : i32
    %c0_i32_0 = arith.constant 0 : i32
    %c0_i32_1 = arith.constant 0 : i32
    return %c0_i32, %c0_i32_0 : i32, i32
  }
  func.func @transform_2(%arg0: i32) -> (i32, i32) {
    %c0_i32 = arith.constant 0 : i32
    %c0_i32_0 = arith.constant 0 : i32
    %c0_i32_1 = arith.constant 0 : i32
    return %c0_i32, %c0_i32_0 : i32, i32
  }
  func.func @transform_3(%arg0: i32) -> (i32, i32) {
    %c0_i32 = arith.constant 0 : i32
    %c0_i32_0 = arith.constant 0 : i32
    %c0_i32_1 = arith.constant 0 : i32
    return %c0_i32, %c0_i32_0 : i32, i32
  }
  func.func @transform_4(%arg0: i32) -> (i32, i32) {
    %c0_i32 = arith.constant 0 : i32
    %c0_i32_0 = arith.constant 0 : i32
    %c0_i32_1 = arith.constant 0 : i32
    return %c0_i32, %c0_i32_0 : i32, i32
  }
  func.func @transform_5(%arg0: i32) -> (i32, i32) {
    %c0_i32 = arith.constant 0 : i32
    %c0_i32_0 = arith.constant 0 : i32
    %c0_i32_1 = arith.constant 0 : i32
    return %c0_i32, %c0_i32_0 : i32, i32
  }
  func.func @transform_6(%arg0: i32) -> (i32, i32) {
    %c0_i32 = arith.constant 0 : i32
    %c0_i32_0 = arith.constant 0 : i32
    %c0_i32_1 = arith.constant 0 : i32
    return %c0_i32, %c0_i32_0 : i32, i32
  }
  func.func @transform_7(%arg0: i32) -> (i32, i32) {
    %c0_i32 = arith.constant 0 : i32
    %c0_i32_0 = arith.constant 0 : i32
    %c0_i32_1 = arith.constant 0 : i32
    return %c0_i32, %c0_i32_0 : i32, i32
  }
  func.func @transform_8(%arg0: i32) -> (i32, i32) {
    %c0_i32 = arith.constant 0 : i32
    %c0_i32_0 = arith.constant 0 : i32
    %c0_i32_1 = arith.constant 0 : i32
    return %c0_i32, %c0_i32_0 : i32, i32
  }
}

</mosaic_0001>

<bundles_post_ra>
// kernel: tpu_custom_call.1
= control target key start
LH: loop header
LB: loop body
LE: loop exit
PB: predicated region body
PF: predicated region fallthrough
CT: control target
= control target key end

     0   :  { %13 = vsyncpa [#allocation7], 0  ;;  %s1222_s27 = smov 0   ;;  %s1427_s0 = inlined_call_operand.vmem [shape: f32[64,8], index: 0, kind: input, shape index: {}]   ;;  %s1428_s1 = inlined_call_operand.hbm [shape: f32[8,128], index: 1, kind: input, shape index: {}]   ;;  %s1429_s2 = inlined_call_operand.vmem [shape: f32[32,128], index: 2, kind: input, shape index: {}]   ;;  %s1430_s3 = inlined_call_operand.vmem [shape: f32[1,128], index: 3, kind: input, shape index: {}]   ;;  %s1431_s4 = inlined_call_operand.vmem [shape: f32[64,128], index: 4, kind: input, shape index: {}]   ;;  %s1432_s5 = inlined_call_operand.vmem [shape: f32[1,128], index: 5, kind: input, shape index: {}]   ;;  %s1433_s6 = inlined_call_operand.vmem [shape: f32[32,4], index: 6, kind: input, shape index: {}]   ;;  %s1434_s7 = inlined_call_operand.vmem [shape: f32[1,4], index: 7, kind: input, shape index: {}]   ;;  %s1435_s8 = inlined_call_operand.vmem [shape: f32[8,4], index: 8, kind: output, shape index: {}]  }
   0x1 LB: > { %s1228_s28 = sadd.s32 4294967295, %s1170_s27   ;;  %p1008_p0 = scmp.ge.s32.totalorder %s1170_s27, 1  ;;  %s1170_s27 = sphi %s1222_s27, %s19_s27  }
   0x2   : > { %p218_p1 = scmp.lt.s32.totalorder %s1170_s27, 3  ;;  %p1009_p2 = scmp.ne.s32.totalorder %s1228_s28, 0 }
   0x3   : > { %s230_s9 = sshll.u32 %s1428_s1, 4  ;;  %p1048_p4 = scmp.eq.s32.totalorder %s1228_s28, 0  ;;  %s231_s9 = int_to_ptr.hbm [resolvable:$true] %s230_s9 }
   0x4   : > { %p219_p3 = pnand %p1008_p0, %p218_p1  ;;  %s1172_s10 = smov [#allocation6]  }
   0x5   : > { %s232_s11 = sshll.u32 %s1172_s10, 4  ;;  %s233_s11 = int_to_ptr.vmem [resolvable:$true] %s232_s11 }
   0x6   : > { %p1044_p5 = pneg %p219_p3  ;;  %272 = sbr.rel (%p219_p3) target bundleno = 3089 (0xc11), region = 52 }
   0x8   : > { %p1045_p6 = pnand %p1048_p4, %p1044_p5 }
   0xa   : > { %1047 = dma.hbm_to_vmem [thread:$0]  (!%p1045_p6), %s231_s9, 128, %s233_s11, [#allocation7]  }
   0xb   : > { %1165 = dma.done.wait (%p1048_p4), [#allocation7], 128  }
   0xc   : > { %1167 = vsyncadd (%p1048_p4), [#allocation7], 4294967168  ;;  %s1013_s12 = sshll.u32 %s1228_s28, 2 }
   0xd   : > { %p303_p7 = scmp.lt.s32.totalorder %s1013_s12, 7  ;;  %311 = sbr.rel (%p1009_p2) target bundleno = 23 (0x17), region = 60 }
   0xf   : > { %s1437_s12 = smov (!%p303_p7, %s1013_s12), 7 }
  0x10   : > { %s1014_s13 = sshll.u32 %s1437_s12, 3 }
  0x11   : > { %s1241_s16 = scalar_lea.vmem %s1427_s0, %s1014_s13 }
  0x12   : > { %vm312_vm0 = vcmask 261120   ;;  %v1173_v0 = vmov 0.0  }
  0x13   : > { %313 = vst.msk [vmem:[#allocation2] sm:$0xff] %vm312_vm0, %v1173_v0 }
  0x14   : > { %314 = vst.msk [vmem:[#allocation3] sm:$0xff] %vm312_vm0, %v1173_v0 }
  0x15   : > { %315 = vst.msk [vmem:[#allocation4] sm:$0xff] %vm312_vm0, %v1173_v0 }
  0x16   : > { %316 = vst.msk [vmem:[#allocation5] sm:$0xff] %vm312_vm0, %v1173_v0 }
  0x17 PF: > { %v1248_v1 = vld [vmem:[%s1429_s2 + $0x18] sm:$0xff]  ;;  %v1253_v2 = vld [vmem:[%s1429_s2 + $0x10] sm:$0xff]  ;;  %v321_v3 = vld [vmem:[#allocation6] sm:$0xff]  ;;  %vm326_vm1 = vcmask 64512   ;;  %vm385_vm2 = vcmask 261120   ;;  %s1174_s29 = smov 64  }
  0x18   : > { %401 = vmatpush.msra.mxu1 %v1248_v1  ;;  %354 = vmatpush.msra.mxu0 %v321_v3  ;;  %v317_v4 = vld [vmem:[%s1241_s16] sm:$0xff]  ;;  %v1260_v5 = vld [vmem:[%s1429_s2 + $0x8] sm:$0xff]  ;;  %s1175_s30 = smov 32   ;;  %v383_v35 = vld [vmem:[%s1431_s4 + $0x38] sm:$0xff]  ;;  %vm463_vm7 = vcmask 523264   ;;  %p1036_p8 = scmp.ne.s32.totalorder %s1228_s28, 1 }
  0x19   : > { %1016 = vmatmul.msk.f32.vlgmr.msra.gmra.mxu0 %vm326_vm1, %v317_v4  ;;  %542 = vmatpush.msra.mxu3 %v1248_v1  ;;  %v1268_v6 = vld [vmem:[%s1429_s2] sm:$0xff]  ;;  %v382_v36 = vld [vmem:[%s1431_s4 + $0x30] sm:$0xff]  ;;  %v381_v37 = vld [vmem:[%s1431_s4 + $0x28] sm:$0xff] }
  0x1a   : > { %402 = vmatpush.msra.mxu1 %v1253_v2  ;;  %v368_v7 = vld [vmem:[#allocation2] sm:$0xff]  ;;  %475 = vmatpush.msra.mxu2 %v383_v35  ;;  %v379_v42 = vld [vmem:[%s1431_s4 + $0x18] sm:$0xff]  ;;  %v318_v43 = vld [vmem:[%s1241_s16 + $0x8] sm:$0xff] }
  0x1b   : > { %543 = vmatpush.msra.mxu3 %v1253_v2  ;;  %v1283_v8 = vld [vmem:[%s1430_s3] ss:$0 sm:$0xff]  ;;  %v369_v14 = vld [vmem:[#allocation3] sm:$0xff]  ;;  %866 = vmatpush.msrb.mxu0 %v383_v35  ;;  %v378_v44 = vld [vmem:[%s1431_s4 + $0x10] sm:$0xff] }
  0x1c   : > { %403 = vmatpush.msra.mxu1 %v1260_v5  ;;  %476 = vmatpush.msra.mxu2 %v382_v36  ;;  %v370_v40 = vld [vmem:[#allocation4] sm:$0xff]  ;;  %v380_v41 = vld [vmem:[%s1431_s4 + $0x20] sm:$0xff]  ;;  %v377_v45 = vld [vmem:[%s1431_s4 + $0x8] sm:$0xff] }
  0x1d   : > { %544 = vmatpush.msra.mxu3 %v1260_v5  ;;  %867 = vmatpush.msrb.mxu0 %v382_v36  ;;  %v376_v46 = vld [vmem:[%s1431_s4] sm:$0xff]  ;;  %v371_v58 = vld [vmem:[#allocation5] sm:$0xff] }
  0x1e   : > { %404 = vmatpush.msra.mxu1 %v1268_v6  ;;  %477 = vmatpush.msra.mxu2 %v381_v37  ;;  %v1332_v54 = vld [vmem:[%s1432_s5] ss:$0 sm:$0xff] }
  0x1f   : > { %1020 = vmatmul.msk.f32.vlgmr.msra.gmra.mxu1 %vm385_vm2, %v368_v7  ;;  %545 = vmatpush.msra.mxu3 %v1268_v6 }
  0x20   : > { %608 = vmatpush.msrb.mxu1 %v383_v35  ;;  %868 = vmatpush.msrb.mxu0 %v381_v37 }
  0x21   : > { %671 = vmatpush.msrb.mxu3 %v1248_v1  ;;  %478 = vmatpush.msra.mxu2 %v380_v41 }
  0x22   : > { %609 = vmatpush.msrb.mxu1 %v382_v36  ;;  %1017 = vmatmul.msk.f32.gmra.mxu0 %vm326_vm1, %v318_v43 }
  0x23   : > { %672 = vmatpush.msrb.mxu3 %v1253_v2  ;;  %479 = vmatpush.msra.mxu2 %v379_v42 }
  0x24   : > { %610 = vmatpush.msrb.mxu1 %v381_v37  ;;  %869 = vmatpush.msrb.mxu0 %v380_v41 }
  0x25   : > { %673 = vmatpush.msrb.mxu3 %v1260_v5  ;;  %480 = vmatpush.msra.mxu2 %v378_v44 }
  0x26   : > { %611 = vmatpush.msrb.mxu1 %v380_v41  ;;  %870 = vmatpush.msrb.mxu0 %v379_v42 }
  0x27   : > { %674 = vmatpush.msrb.mxu3 %v1268_v6  ;;  %481 = vmatpush.msra.mxu2 %v377_v45 }
  0x28   : > { %612 = vmatpush.msrb.mxu1 %v379_v42  ;;  %871 = vmatpush.msrb.mxu0 %v378_v44 }
  0x29   : > { %482 = vmatpush.msra.mxu2 %v376_v46 }
  0x2a   : > { %613 = vmatpush.msrb.mxu1 %v378_v44  ;;  %872 = vmatpush.msrb.mxu0 %v377_v45 }
  0x2b   : > { %737 = vmatpush.msrb.mxu2 %v383_v35 }
  0x2c   : > { %614 = vmatpush.msrb.mxu1 %v377_v45  ;;  %873 = vmatpush.msrb.mxu0 %v376_v46 }
  0x2d   : > { %738 = vmatpush.msrb.mxu2 %v382_v36 }
  0x2e   : > { %615 = vmatpush.msrb.mxu1 %v376_v46 }
  0x2f   : > { %739 = vmatpush.msrb.mxu2 %v381_v37 }
  0x31   : > { %740 = vmatpush.msrb.mxu2 %v380_v41 }
  0x33   : > { %741 = vmatpush.msrb.mxu2 %v379_v42 }
  0x35   : > { %742 = vmatpush.msrb.mxu2 %v378_v44 }
  0x37   : > { %743 = vmatpush.msrb.mxu2 %v377_v45 }
  0x39   : > { %744 = vmatpush.msrb.mxu2 %v376_v46 }
  0x96   : > { %v356_v9 = vpop.f32.mrf.mxu0 }
  0x97   : > { %v357_v10 = vadd.f32 %v1283_v8, %v356_v9 }
  0x9c   : > { %v406_v11 = vpop.f32.mrf.mxu1 }
  0x9d   : > { %v409_v12 = vadd.f32 %v406_v11, %v357_v10 }
  0x9f   : > { %1065 = vtanh.f32 %v409_v12  ;;  %v1021_v15 = vmul.f32 -1.442695, %v409_v12  ;;  %v359_v50 = vpop.f32.mrf.mxu0 }
  0xa0   : > { %v360_v51 = vadd.f32 %v1283_v8, %v359_v50 }
  0xa1   : > { %1067 = vpow2.f32 %v1021_v15 }
  0xa5   : > { %v1066_v13 = vpop.eup %1065 }
  0xa6   : > { %436 = vrot.lane.b32.xlu0 %v1066_v13, %s1174_s29 }
  0xa7   : > { %v1068_v16 = vpop.eup %1067 }
  0xa8   : > { %v413_v17 = vadd.f32 1.0, %v1068_v16 }
  0xaa   : > { %1069 = vrcp.f32 %v413_v17  ;;  %v425_v23 = vand.u32 2147483648, %v413_v17  ;;  %vm419_vm4 = vweird.f32 %v413_v17  ;;  %v423_v24 = vand.u32 2147483647, %v413_v17 }
  0xac   : > { %v426_v26 = vor.u32 1.1754944e-38, %v425_v23  ;;  %vm424_vm6 = vcmp.eq.f32.partialorder %v423_v24, 8.507059e+37 }
  0xae   : > { %431 = vrot.lane.b32.xlu0 %v369_v14, %s1175_s30 }
  0xb0   : > { %v1070_v18 = vpop.eup %1069 }
  0xb1   : > { %v415_v19 = vmul.f32 %v1070_v18, %v413_v17  ;;  %vm420_vm3 = vweird.f32 %v1070_v18 }
  0xb2   : > { %vm421_vm5 = vmor %vm419_vm4, %vm420_vm3 }
  0xb3   : > { %v416_v20 = vsub.f32 1.0, %v415_v19 }
  0xb5   : > { %v417_v21 = vmul.f32 %v1070_v18, %v416_v20 }
  0xb7   : > { %v418_v22 = vadd.f32 %v1070_v18, %v417_v21 }
  0xb9   : > { %v422_v25 = vsel %vm421_vm5, %v1070_v18, %v418_v22 }
  0xba   : > { %v427_v28 = vsel %vm424_vm6, %v426_v26, %v422_v25 }
 0x118   : > { %v437_v27 = vpop.permute.xlu0 %436 }
 0x119   : > { %v439_v29 = vmul.f32 %v437_v27, %v427_v28 }
 0x11b   : > { %441 = vrot.lane.b32.xlu1 %v439_v29, %s1175_s30 }
 0x120   : > { %v432_v30 = vpop.permute.xlu0 %431 }
 0x121   : > { %v434_v31 = vmul.f32 %v432_v30, %v427_v28 }
 0x18d   : > { %v442_v32 = vpop.permute.xlu1 %441 }
 0x18e   : > { %v1289_v33 = vadd.f32 %v442_v32, %v434_v31 }
 0x190   : > { %1071 = vtanh.f32 %v1289_v33 }
 0x196   : > { %v1072_v34 = vpop.eup %1071 }
 0x197   : > { %447 = vrot.lane.b32.xlu1 %v1072_v34, %s1174_s29 }
 0x209   : > { %v448_v38 = vpop.permute.xlu1 %447 }
 0x20a   : > { %v450_v39 = vmul.f32 %v448_v38, %v427_v28 }
 0x20c   : > { %452 = vrot.lane.b32.xlu2 %v450_v39, %s1175_s30 }
 0x214   : > { %456 = vrot.lane.b32.xlu2 %v370_v40, %s1175_s30  ;;  %v319_v40 = vld [vmem:[%s1241_s16 + $0x10] sm:$0xff] }
 0x215   : > { %1018 = vmatmul.msk.f32.gmra.mxu0 %vm326_vm1, %v319_v40 }
 0x266   : > { %v453_v47 = vpop.permute.xlu2 %452 }
 0x267   : > { %1024 = vmatmul.msk.f32.vlgmr.msra.gmra.mxu3 %vm385_vm2, %v453_v47 }
 0x268   : > { %800 = vmatpush.msra.mxu3 %v1248_v1 }
 0x26a   : > { %801 = vmatpush.msra.mxu3 %v1253_v2 }
 0x26c   : > { %802 = vmatpush.msra.mxu3 %v1260_v5 }
 0x26e   : > { %v457_v48 = vpop.permute.xlu2 %456  ;;  %803 = vmatpush.msra.mxu3 %v1268_v6 }
 0x26f   : > { %v459_v49 = vsel %vm385_vm2, %v453_v47, %v457_v48 }
 0x270   : > { %1022 = vmatmul.msk.f32.vlgmr.msra.gmra.mxu2 %vm463_vm7, %v459_v49 }
 0x292   : > { %v362_v44 = vpop.f32.mrf.mxu0 }
 0x293   : > { %v363_v45 = vadd.f32 %v1283_v8, %v362_v44 }
 0x2ea   : > { %v547_v52 = vpop.f32.mrf.mxu3 }
 0x2eb   : > { %v550_v53 = vadd.f32 %v547_v52, %v360_v51 }
 0x2ed   : > { %1073 = vtanh.f32 %v550_v53  ;;  %v1025_v60 = vmul.f32 -1.442695, %v550_v53 }
 0x2f3   : > { %v1074_v55 = vpop.eup %1073  ;;  %v484_v56 = vpop.f32.mrf.mxu2 }
 0x2f4   : > { %v485_v57 = vadd.f32 %v1332_v54, %v484_v56  ;;  %573 = vrot.lane.b32.xlu0 %v1074_v55, %s1174_s29 }
 0x2f6   : > { %1075 = vtanh.f32 %v485_v57  ;;  %v1023_v61 = vmul.f32 -1.442695, %v485_v57 }
 0x2f7   : > { %1077 = vpow2.f32 %v1025_v60 }
 0x2f8   : > { %1079 = vpow2.f32 %v1023_v61 }
 0x2fc   : > { %v1076_v59 = vpop.eup %1075  ;;  %508 = vrot.lane.b32.xlu0 %v371_v58, %s1175_s30 }
 0x2fd   : > { %513 = vrot.lane.b32.xlu1 %v1076_v59, %s1174_s29  ;;  %v1078_v62 = vpop.eup %1077 }
 0x2fe   : > { %v554_v63 = vadd.f32 1.0, %v1078_v62  ;;  %v1080_v0 = vpop.eup %1079 }
 0x2ff   : > { %v490_v1 = vadd.f32 1.0, %v1080_v0 }
 0x300   : > { %1081 = vrcp.f32 %v554_v63  ;;  %v566_v10 = vand.u32 2147483648, %v554_v63  ;;  %vm560_vm9 = vweird.f32 %v554_v63  ;;  %v564_v12 = vand.u32 2147483647, %v554_v63 }
 0x301   : > { %1083 = vrcp.f32 %v490_v1  ;;  %v502_v20 = vand.u32 2147483648, %v490_v1  ;;  %vm496_vm13 = vweird.f32 %v490_v1  ;;  %v500_v21 = vand.u32 2147483647, %v490_v1 }
 0x302   : > { %v567_v14 = vor.u32 1.1754944e-38, %v566_v10  ;;  %vm565_vm11 = vcmp.eq.f32.partialorder %v564_v12, 8.507059e+37 }
 0x303   : > { %v503_v23 = vor.u32 1.1754944e-38, %v502_v20  ;;  %vm501_vm15 = vcmp.eq.f32.partialorder %v500_v21, 8.507059e+37 }
 0x306   : > { %v1082_v2 = vpop.eup %1081 }
 0x307   : > { %v556_v3 = vmul.f32 %v1082_v2, %v554_v63  ;;  %v1084_v5 = vpop.eup %1083  ;;  %vm561_vm8 = vweird.f32 %v1082_v2 }
 0x308   : > { %v492_v7 = vmul.f32 %v1084_v5, %v490_v1  ;;  %vm562_vm10 = vmor %vm560_vm9, %vm561_vm8  ;;  %vm497_vm12 = vweird.f32 %v1084_v5 }
 0x309   : > { %v557_v4 = vsub.f32 1.0, %v556_v3  ;;  %vm498_vm14 = vmor %vm496_vm13, %vm497_vm12 }
 0x30a   : > { %v493_v11 = vsub.f32 1.0, %v492_v7 }
 0x30b   : > { %v558_v6 = vmul.f32 %v1082_v2, %v557_v4 }
 0x30c   : > { %v494_v15 = vmul.f32 %v1084_v5, %v493_v11 }
 0x30d   : > { %v559_v9 = vadd.f32 %v1082_v2, %v558_v6 }
 0x30e   : > { %v495_v19 = vadd.f32 %v1084_v5, %v494_v15 }
 0x30f   : > { %v563_v13 = vsel %vm562_vm10, %v1082_v2, %v559_v9 }
 0x310   : > { %v568_v17 = vsel %vm565_vm11, %v567_v14, %v563_v13  ;;  %v499_v22 = vsel %vm498_vm14, %v1084_v5, %v495_v19 }
 0x311   : > { %v504_v24 = vsel %vm501_vm15, %v503_v23, %v499_v22  ;;  %v571_v27 = vmul.f32 %v568_v17, %v1289_v33 }
 0x366   : > { %v574_v16 = vpop.permute.xlu0 %573 }
 0x367   : > { %v576_v18 = vmul.f32 %v574_v16, %v568_v17 }
 0x369   : > { %578 = vrot.lane.b32.xlu2 %v576_v18, %s1175_s30 }
 0x36e   : > { %v509_v31 = vpop.permute.xlu0 %508 }
 0x36f   : > { %v514_v25 = vpop.permute.xlu1 %513  ;;  %v511_v32 = vmul.f32 %v509_v31, %v504_v24 }
 0x370   : > { %v516_v26 = vmul.f32 %v514_v25, %v504_v24 }
 0x372   : > { %518 = vrot.lane.b32.xlu1 %v516_v26, %s1175_s30 }
 0x3c3   : > { %v579_v28 = vpop.permute.xlu2 %578 }
 0x3c4   : > { %v1341_v29 = vadd.f32 %v579_v28, %v571_v27 }
 0x3c6   : > { %1085 = vtanh.f32 %v1341_v29 }
 0x3cc   : > { %v1086_v30 = vpop.eup %1085 }
 0x3cd   : > { %584 = vrot.lane.b32.xlu2 %v1086_v30, %s1174_s29 }
 0x3e4   : > { %v519_v34 = vpop.permute.xlu1 %518 }
 0x3e5   : > { %v1345_v35 = vadd.f32 %v519_v34, %v511_v32  ;;  %v320_v32 = vld [vmem:[%s1241_s16 + $0x18] sm:$0xff]  ;;  %s1176_s16 = smov 96  }
 0x3e6   : > { %1019 = vmatmul.msk.f32.gmra.mxu0 %vm326_vm1, %v320_v32 }
 0x3e7   : > { %1087 = vtanh.f32 %v1345_v35 }
 0x3ed   : > { %v1088_v36 = vpop.eup %1087 }
 0x3ee   : > { %524 = vrot.lane.b32.xlu0 %v1088_v36, %s1174_s29 }
 0x427   : > { %v585_v33 = vpop.permute.xlu2 %584 }
 0x428   : > { %v587_v37 = vmul.f32 %v585_v33, %v568_v17 }
 0x42a   : > { %589 = vrot.lane.b32.xlu1 %v587_v37, %s1175_s30 }
 0x460   : > { %v525_v38 = vpop.permute.xlu0 %524 }
 0x461   : > { %v527_v39 = vmul.f32 %v525_v38, %v504_v24 }
 0x463   : > { %593 = vrot.lane.b32.xlu2 %v527_v39, %s1174_s29  ;;  %v365_v33 = vpop.f32.mrf.mxu0 }
 0x464   : > { %v366_v37 = vadd.f32 %v1283_v8, %v365_v33 }
 0x49c   : > { %v590_v41 = vpop.permute.xlu1 %589 }
 0x49d   : > { %1028 = vmatmul.msk.f32.vlgmr.msrb.gmra.mxu3 %vm385_vm2, %v590_v41 }
 0x4bd   : > { %v594_v42 = vpop.permute.xlu2 %593 }
 0x4be   : > { %v596_v43 = vsel %vm385_vm2, %v590_v41, %v594_v42 }
 0x4bf   : > { %1026 = vmatmul.msk.f32.vlgmr.msrb.gmra.mxu1 %vm463_vm7, %v596_v43 }
 0x520   : > { %v676_v46 = vpop.f32.mrf.mxu3 }
 0x521   : > { %v679_v47 = vadd.f32 %v676_v46, %v363_v45 }
 0x523   : > { %1089 = vtanh.f32 %v679_v47  ;;  %v1029_v52 = vmul.f32 -1.442695, %v679_v47 }
 0x529   : > { %v1090_v48 = vpop.eup %1089 }
 0x52a   : > { %702 = vrot.lane.b32.xlu1 %v1090_v48, %s1174_s29 }
 0x53c   : > { %v617_v49 = vpop.f32.mrf.mxu1 }
 0x53d   : > { %v618_v50 = vadd.f32 %v1332_v54, %v617_v49 }
 0x53f   : > { %1091 = vtanh.f32 %v618_v50  ;;  %v1027_v58 = vmul.f32 -1.442695, %v618_v50 }
 0x540   : > { %1093 = vpow2.f32 %v1029_v52 }
 0x545   : > { %v1092_v51 = vpop.eup %1091 }
 0x546   : > { %642 = vrot.lane.b32.xlu0 %v1092_v51, %s1174_s29  ;;  %v1094_v53 = vpop.eup %1093 }
 0x547   : > { %v683_v55 = vadd.f32 1.0, %v1094_v53 }
 0x549   : > { %1095 = vrcp.f32 %v683_v55  ;;  %v695_v63 = vand.u32 2147483648, %v683_v55  ;;  %vm689_vm3 = vweird.f32 %v683_v55  ;;  %v693_v0 = vand.u32 2147483647, %v683_v55 }
 0x54a   : > { %1097 = vpow2.f32 %v1027_v58 }
 0x54b   : > { %v696_v3 = vor.u32 1.1754944e-38, %v695_v63  ;;  %vm694_vm5 = vcmp.eq.f32.partialorder %v693_v0, 8.507059e+37 }
 0x54f   : > { %v1096_v56 = vpop.eup %1095 }
 0x550   : > { %v685_v57 = vmul.f32 %v1096_v56, %v683_v55  ;;  %v1098_v61 = vpop.eup %1097  ;;  %vm690_vm0 = vweird.f32 %v1096_v56 }
 0x551   : > { %v623_v1 = vadd.f32 1.0, %v1098_v61  ;;  %vm691_vm4 = vmor %vm689_vm3, %vm690_vm0 }
 0x552   : > { %v686_v59 = vsub.f32 1.0, %v685_v57 }
 0x553   : > { %1099 = vrcp.f32 %v623_v1  ;;  %v635_v13 = vand.u32 2147483648, %v623_v1  ;;  %vm629_vm8 = vweird.f32 %v623_v1  ;;  %v633_v14 = vand.u32 2147483647, %v623_v1 }
 0x554   : > { %v687_v60 = vmul.f32 %v1096_v56, %v686_v59 }
 0x555   : > { %v636_v16 = vor.u32 1.1754944e-38, %v635_v13  ;;  %vm634_vm10 = vcmp.eq.f32.partialorder %v633_v14, 8.507059e+37 }
 0x556   : > { %v688_v62 = vadd.f32 %v1096_v56, %v687_v60 }
 0x558   : > { %v692_v2 = vsel %vm691_vm4, %v1096_v56, %v688_v62 }
 0x559   : > { %v697_v5 = vsel %vm694_vm5, %v696_v3, %v692_v2  ;;  %v1100_v7 = vpop.eup %1099 }
 0x55a   : > { %v625_v9 = vmul.f32 %v1100_v7, %v623_v1  ;;  %vm630_vm6 = vweird.f32 %v1100_v7  ;;  %v700_v20 = vmul.f32 %v697_v5, %v1341_v29 }
 0x55b   : > { %vm631_vm9 = vmor %vm629_vm8, %vm630_vm6 }
 0x55c   : > { %v626_v10 = vsub.f32 1.0, %v625_v9 }
 0x55e   : > { %v627_v11 = vmul.f32 %v1100_v7, %v626_v10 }
 0x560   : > { %v628_v12 = vadd.f32 %v1100_v7, %v627_v11 }
 0x562   : > { %v632_v15 = vsel %vm631_vm9, %v1100_v7, %v628_v12 }
 0x563   : > { %v637_v18 = vsel %vm634_vm10, %v636_v16, %v632_v15 }
 0x564   : > { %v640_v23 = vmul.f32 %v637_v18, %v1345_v35 }
 0x59c   : > { %v703_v4 = vpop.permute.xlu1 %702 }
 0x59d   : > { %v705_v6 = vmul.f32 %v703_v4, %v697_v5 }
 0x59f   : > { %707 = vrot.lane.b32.xlu0 %v705_v6, %s1175_s30 }
 0x5b8   : > { %v643_v17 = vpop.permute.xlu0 %642 }
 0x5b9   : > { %v645_v19 = vmul.f32 %v643_v17, %v637_v18 }
 0x5bb   : > { %647 = vrot.lane.b32.xlu2 %v645_v19, %s1175_s30 }
 0x611   : > { %v708_v21 = vpop.permute.xlu0 %707 }
 0x612   : > { %v1363_v22 = vadd.f32 %v708_v21, %v700_v20 }
 0x614   : > { %1101 = vtanh.f32 %v1363_v22 }
 0x615   : > { %v648_v24 = vpop.permute.xlu2 %647 }
 0x616   : > { %v1367_v25 = vadd.f32 %v648_v24, %v640_v23 }
 0x618   : > { %1103 = vtanh.f32 %v1367_v25 }
 0x61a   : > { %v1102_v26 = vpop.eup %1101 }
 0x61b   : > { %713 = vrot.lane.b32.xlu2 %v1102_v26, %s1174_s29 }
 0x61e   : > { %v1104_v27 = vpop.eup %1103 }
 0x61f   : > { %653 = vrot.lane.b32.xlu1 %v1104_v27, %s1174_s29 }
 0x675   : > { %v714_v28 = vpop.permute.xlu2 %713 }
 0x676   : > { %v716_v29 = vmul.f32 %v714_v28, %v697_v5 }
 0x678   : > { %718 = vrot.lane.b32.xlu0 %v716_v29, %s1175_s30 }
 0x691   : > { %v654_v30 = vpop.permute.xlu1 %653 }
 0x692   : > { %v656_v31 = vmul.f32 %v654_v30, %v637_v18 }
 0x694   : > { %722 = vrot.lane.b32.xlu1 %v656_v31, %s1174_s29 }
 0x6ea   : > { %v719_v34 = vpop.permute.xlu0 %718 }
 0x6eb   : > { %1032 = vmatmul.msk.f32.vlgmr.msra.gmra.mxu3 %vm385_vm2, %v719_v34 }
 0x706   : > { %v723_v35 = vpop.permute.xlu1 %722 }
 0x707   : > { %v725_v36 = vsel %vm385_vm2, %v719_v34, %v723_v35 }
 0x708   : > { %1030 = vmatmul.msk.f32.vlgmr.msrb.gmra.mxu2 %vm463_vm7, %v725_v36 }
 0x76e   : > { %v805_v38 = vpop.f32.mrf.mxu3 }
 0x76f   : > { %v808_v39 = vadd.f32 %v805_v38, %v366_v37 }
 0x771   : > { %1105 = vtanh.f32 %v808_v39  ;;  %v1033_v44 = vmul.f32 -1.442695, %v808_v39 }
 0x777   : > { %v1106_v40 = vpop.eup %1105 }
 0x778   : > { %831 = vrot.lane.b32.xlu0 %v1106_v40, %s1174_s29 }
 0x78b   : > { %v746_v41 = vpop.f32.mrf.mxu2 }
 0x78c   : > { %v747_v42 = vadd.f32 %v1332_v54, %v746_v41 }
 0x78e   : > { %1107 = vtanh.f32 %v747_v42  ;;  %v1031_v45 = vmul.f32 -1.442695, %v747_v42 }
 0x78f   : > { %1109 = vpow2.f32 %v1033_v44 }
 0x790   : > { %1111 = vpow2.f32 %v1031_v45 }
 0x794   : > { %v1108_v43 = vpop.eup %1107 }
 0x795   : > { %771 = vrot.lane.b32.xlu2 %v1108_v43, %s1174_s29  ;;  %v1110_v46 = vpop.eup %1109 }
 0x796   : > { %v812_v47 = vadd.f32 1.0, %v1110_v46  ;;  %v1112_v8 = vpop.eup %1111 }
 0x797   : > { %v752_v48 = vadd.f32 1.0, %v1112_v8 }
 0x798   : > { %1113 = vrcp.f32 %v812_v47  ;;  %v824_v58 = vand.u32 2147483648, %v812_v47  ;;  %vm818_vm11 = vweird.f32 %v812_v47  ;;  %v822_v60 = vand.u32 2147483647, %v812_v47 }
 0x799   : > { %1115 = vrcp.f32 %v752_v48  ;;  %v764_v0 = vand.u32 2147483648, %v752_v48  ;;  %vm758_vm15 = vweird.f32 %v752_v48  ;;  %v762_v3 = vand.u32 2147483647, %v752_v48 }
 0x79a   : > { %v825_v62 = vor.u32 1.1754944e-38, %v824_v58  ;;  %vm823_vm14 = vcmp.eq.f32.partialorder %v822_v60, 8.507059e+37 }
 0x79b   : > { %v765_v6 = vor.u32 1.1754944e-38, %v764_v0  ;;  %vm763_vm3 = vcmp.eq.f32.partialorder %v762_v3, 8.507059e+37 }
 0x79e   : > { %v1114_v49 = vpop.eup %1113 }
 0x79f   : > { %v814_v50 = vmul.f32 %v1114_v49, %v812_v47  ;;  %v1116_v51 = vpop.eup %1115  ;;  %vm819_vm1 = vweird.f32 %v1114_v49 }
 0x7a0   : > { %v754_v53 = vmul.f32 %v1116_v51, %v752_v48  ;;  %vm820_vm12 = vmor %vm818_vm11, %vm819_vm1  ;;  %vm759_vm13 = vweird.f32 %v1116_v51 }
 0x7a1   : > { %v815_v52 = vsub.f32 1.0, %v814_v50  ;;  %vm760_vm0 = vmor %vm758_vm15, %vm759_vm13 }
 0x7a2   : > { %v755_v56 = vsub.f32 1.0, %v754_v53 }
 0x7a3   : > { %v816_v55 = vmul.f32 %v1114_v49, %v815_v52 }
 0x7a4   : > { %v756_v59 = vmul.f32 %v1116_v51, %v755_v56 }
 0x7a5   : > { %v817_v57 = vadd.f32 %v1114_v49, %v816_v55 }
 0x7a6   : > { %v757_v63 = vadd.f32 %v1116_v51, %v756_v59 }
 0x7a7   : > { %v821_v61 = vsel %vm820_vm12, %v1114_v49, %v817_v57 }
 0x7a8   : > { %v826_v2 = vsel %vm823_vm14, %v825_v62, %v821_v61  ;;  %v761_v5 = vsel %vm760_vm0, %v1116_v51, %v757_v63 }
 0x7a9   : > { %v766_v9 = vsel %vm763_vm3, %v765_v6, %v761_v5  ;;  %v829_v11 = vmul.f32 %v826_v2, %v1363_v22 }
 0x7aa   : > { %v769_v15 = vmul.f32 %v766_v9, %v1367_v25 }
 0x7ea   : > { %v832_v1 = vpop.permute.xlu0 %831 }
 0x7eb   : > { %v834_v4 = vmul.f32 %v832_v1, %v826_v2 }
 0x7ed   : > { %836 = vrot.lane.b32.xlu2 %v834_v4, %s1175_s30 }
 0x7ef   : > { %v772_v7 = vpop.permute.xlu2 %771 }
 0x7f0   : > { %v774_v10 = vmul.f32 %v772_v7, %v766_v9 }
 0x7f2   : > { %776 = vrot.lane.b32.xlu1 %v774_v10, %s1175_s30 }
 0x847   : > { %v837_v12 = vpop.permute.xlu2 %836 }
 0x848   : > { %v839_v13 = vadd.f32 %v837_v12, %v829_v11 }
 0x84a   : > { %1117 = vtanh.f32 %v839_v13 }
 0x850   : > { %v1118_v14 = vpop.eup %1117 }
 0x851   : > { %842 = vrot.lane.b32.xlu1 %v1118_v14, %s1174_s29 }
 0x864   : > { %v777_v16 = vpop.permute.xlu1 %776 }
 0x865   : > { %v779_v17 = vadd.f32 %v777_v16, %v769_v15 }
 0x867   : > { %1119 = vtanh.f32 %v779_v17 }
 0x86d   : > { %v1120_v18 = vpop.eup %1119 }
 0x86e   : > { %782 = vrot.lane.b32.xlu0 %v1120_v18, %s1174_s29 }
 0x8c3   : > { %v843_v19 = vpop.permute.xlu1 %842 }
 0x8c4   : > { %v845_v20 = vmul.f32 %v843_v19, %v826_v2 }
 0x8c6   : > { %847 = vrot.lane.b32.xlu2 %v845_v20, %s1175_s30 }
 0x8e0   : > { %v783_v21 = vpop.permute.xlu0 %782 }
 0x8e1   : > { %v785_v22 = vmul.f32 %v783_v21, %v766_v9 }
 0x8e3   : > { %851 = vrot.lane.b32.xlu0 %v785_v22, %s1174_s29 }
 0x920   : > { %v848_v23 = vpop.permute.xlu2 %847 }
 0x921   : > { %915 = vst.msk [vmem:[#allocation2] sm:$0xff] %vm385_vm2, %v848_v23 }
 0x955   : > { %v852_v24 = vpop.permute.xlu0 %851 }
 0x956   : > { %v854_v25 = vsel %vm385_vm2, %v848_v23, %v852_v24 }
 0x957   : > { %1034 = vmatmul.msk.f32.vlgmr.msrb.gmra.mxu0 %vm463_vm7, %v854_v25 }
 0x9d4   : > { %v875_v26 = vpop.f32.mrf.mxu0 }
 0x9d5   : > { %v876_v27 = vadd.f32 %v1332_v54, %v875_v26 }
 0x9d7   : > { %1121 = vtanh.f32 %v876_v27  ;;  %v1035_v29 = vmul.f32 -1.442695, %v876_v27 }
 0x9d9   : > { %1123 = vpow2.f32 %v1035_v29 }
 0x9dd   : > { %v1122_v28 = vpop.eup %1121 }
 0x9de   : > { %900 = vrot.lane.b32.xlu1 %v1122_v28, %s1174_s29 }
 0x9df   : > { %v1124_v30 = vpop.eup %1123 }
 0x9e0   : > { %v881_v31 = vadd.f32 1.0, %v1124_v30 }
 0x9e2   : > { %1125 = vrcp.f32 %v881_v31  ;;  %v893_v37 = vand.u32 2147483648, %v881_v31  ;;  %vm887_vm4 = vweird.f32 %v881_v31  ;;  %v891_v54 = vand.u32 2147483647, %v881_v31 }
 0x9e4   : > { %v894_v39 = vor.u32 1.1754944e-38, %v893_v37  ;;  %vm892_vm6 = vcmp.eq.f32.partialorder %v891_v54, 8.507059e+37 }
 0x9e6   : > { %917 = vrot.lane.b32.xlu1 %v839_v13, %s1176_s16 }
 0x9e8   : > { %v1126_v32 = vpop.eup %1125 }
 0x9e9   : > { %v883_v34 = vmul.f32 %v1126_v32, %v881_v31  ;;  %vm888_vm7 = vweird.f32 %v1126_v32 }
 0x9ea   : > { %vm889_vm5 = vmor %vm887_vm4, %vm888_vm7 }
 0x9eb   : > { %v884_v35 = vsub.f32 1.0, %v883_v34 }
 0x9ed   : > { %v885_v36 = vmul.f32 %v1126_v32, %v884_v35 }
 0x9ef   : > { %v886_v33 = vadd.f32 %v1126_v32, %v885_v36 }
 0x9f1   : > { %v890_v38 = vsel %vm889_vm5, %v1126_v32, %v886_v33 }
 0x9f2   : > { %v895_v41 = vsel %vm892_vm6, %v894_v39, %v890_v38 }
 0x9f3   : > { %v898_v44 = vmul.f32 %v895_v41, %v779_v17 }
 0xa50   : > { %v901_v40 = vpop.permute.xlu1 %900 }
 0xa51   : > { %v903_v42 = vmul.f32 %v901_v40, %v895_v41 }
 0xa53   : > { %905 = vrot.lane.b32.xlu2 %v903_v42, %s1175_s30 }
 0xa58   : > { %v918_v43 = vpop.permute.xlu1 %917 }
 0xa59   : > { %920 = vst.msk [vmem:[#allocation3] sm:$0xff] %vm385_vm2, %v918_v43 }
 0xaad   : > { %v906_v45 = vpop.permute.xlu2 %905 }
 0xaae   : > { %v908_v46 = vadd.f32 %v906_v45, %v898_v44 }
 0xab0   : > { %1127 = vtanh.f32 %v908_v46 }
 0xab6   : > { %v1128_v47 = vpop.eup %1127 }
 0xab7   : > { %911 = vrot.lane.b32.xlu0 %v1128_v47, %s1174_s29 }
 0xabf   : > { %927 = vrot.lane.b32.xlu0 %v908_v46, %s1176_s16 }
 0xb29   : > { %v912_v8 = vpop.permute.xlu0 %911 }
 0xb2a   : > { %v914_v48 = vmul.f32 %v912_v8, %v895_v41 }
 0xb2c   : > { %922 = vrot.lane.b32.xlu2 %v914_v48, %s1175_s30 }
 0xb31   : > { %v928_v49 = vpop.permute.xlu0 %927 }
 0xb32   : > { %930 = vst.msk [vmem:[#allocation5] sm:$0xff] %vm385_vm2, %v928_v49 }
 0xb83   : > { %934 = sbr.rel (%p1036_p8) target bundleno = 3089 (0xc11), region = 64 }
 0xb86   : > { %v923_v50 = vpop.permute.xlu2 %922 }
 0xb87   : > { %925 = vst.msk [vmem:[#allocation4] sm:$0xff] %vm385_vm2, %v923_v50 }
 0xb88   : > { %v938_v51 = vld [vmem:[%s1433_s6 + $0x18] sm:$0xff]  ;;  %v937_v52 = vld [vmem:[%s1433_s6 + $0x10] sm:$0xff]  ;;  %v936_v53 = vld [vmem:[%s1433_s6 + $0x8] sm:$0xff]  ;;  %vm965_vm8 = vcmask 31744  }
 0xb89   : > { %957 = vmatpush.msra.mxu0 %v938_v51  ;;  %v935_v55 = vld [vmem:[%s1433_s6] sm:$0xff] }
 0xb8a   : > { %v1129_v56 = vld [vmem:[%s1434_s7] ss:$0 sm:$0xff] }
 0xb8b   : > { %958 = vmatpush.msra.mxu0 %v937_v52 }
 0xb8d   : > { %959 = vmatpush.msra.mxu0 %v936_v53 }
 0xb8f   : > { %960 = vmatpush.msra.mxu0 %v935_v55 }
 0xb90   : > { %1037 = vmatmul.msk.f32.vlgmr.msra.gmra.mxu0 %vm385_vm2, %v923_v50 }
 0xc0d   : > { %v962_v57 = vpop.f32.mrf.mxu0 }
 0xc0e   : > { %v963_v58 = vadd.f32 %v1129_v56, %v962_v57 }
 0xc10   : > { %966 = vst.msk [vmem:[%s1435_s8] sm:$0xff] %vm965_vm8, %v963_v58 }
 0xc11 PF: > { %s19_s27 = sadd.s32 1, %s1170_s27  }
 0xc12   : > { %p16_p9 = scmp.ge.s32.totalorder %s19_s27, 4  }
 0xc14   :  { %18 = sbr.rel (!%p16_p9) target bundleno = 1 (0x1), region = 91 }
 0xc19   :  { %978 = vsyncpa [#allocation7], 1 }
 0xc1a   :  { %980 = vsyncpa [#allocation7 + $0x1], 1 }

</bundles_post_ra>
